<compile_context>
chip_gen: v7x
topology: tpu7x:2x2x1
jax: 0.10.0
libtpu: 0.0.40
codegen_flags: <defaults>
</compile_context>

<pallas_src>
import functools

import jax
import jax.numpy as jnp
from jax.experimental import pallas as pl
from jax.experimental.pallas import tpu as pltpu


def _retina_entropy_kernel(pred_ref, target_ref, out_ref,
                           counts_ref, colsum_ref, lse_ref,
                           *, batch, mask_padding):
    pid = pl.program_id(0)

    # Zero the accumulators on the first batch tile.
    @pl.when(pid == 0)
    def _init():
        counts_ref[...] = jnp.zeros_like(counts_ref)
        colsum_ref[...] = jnp.zeros_like(colsum_ref)
        lse_ref[...] = jnp.zeros_like(lse_ref)

    pred = pred_ref[...].astype(jnp.float32)             # (TB, C) f32 cast on-chip
    t = target_ref[...]                                   # (TB, 1) int32
    tb, C = pred.shape

    # Numerically-stable log-sum-exp pieces; log-probs never materialized.
    m = jnp.max(pred, axis=1, keepdims=True)              # (TB, 1)
    z = pred - m                                          # (TB, C)
    sumexp = jnp.sum(jnp.exp(z), axis=1, keepdims=True)   # (TB, 1)
    lse = jnp.log(sumexp)                                 # (TB, 1); logprob = z - lse

    # Clipped targets (labels > 1 collapse to 1; pad label -1 matches nothing).
    t_clip = jnp.minimum(t, jnp.int32(1))                 # (TB, 1)
    class_ids = jax.lax.broadcasted_iota(jnp.int32, (tb, C), 1)
    onehot = (class_ids == t_clip).astype(jnp.float32)    # (TB, C)

    if mask_padding:
        # Rows past the true batch size contribute nothing.  This branch is
        # only compiled in when B is not a multiple of the tile.
        row = jax.lax.broadcasted_iota(jnp.int32, (tb, 1), 0) + pid * tb
        valid = row < batch                                # (TB, 1) bool
        z = jnp.where(valid, z, 0.0)
        lse = jnp.where(valid, lse, 0.0)
        onehot = jnp.where(valid, onehot, 0.0)

    counts_ref[...] += jnp.sum(onehot, axis=0, keepdims=True)   # (1, C)
    colsum_ref[...] += jnp.sum(z, axis=0, keepdims=True)        # (1, C)
    lse_ref[...] += jnp.sum(lse, axis=0, keepdims=True)         # (1, 1)

    # Finalize the scalar loss on the last tile only (single output write).
    @pl.when(pid == pl.num_programs(0) - 1)
    def _finalize():
        weighted = jnp.sum(counts_ref[...] * colsum_ref[...],
                           axis=1, keepdims=True)                # (1, 1)
        out_ref[...] = lse_ref[...] - weighted * jnp.float32(1.0 / batch)


def _round_up(x, m):
    return ((x + m - 1) // m) * m


def _choose_block_b(B, C, dtype):
    """Batch-tile rows: multiple of 8, ~<=2 MiB per pred tile so the
    double-buffered pipeline stays well under the v5e 16 MiB scoped default
    and v7x's 64 MiB physical VMEM, while large enough (>=512 rows when the
    batch allows) to amortize the ~0.35 us per-grid-step overhead."""
    itemsize = jnp.dtype(dtype).itemsize
    target_bytes = 2 * 1024 * 1024
    tb = target_bytes // max(C * itemsize, 1)
    tb = max(8, (tb // 8) * 8)
    tb = min(tb, 2048)
    tb = min(tb, _round_up(B, 8))
    return int(tb)


def retina_entropy_loss(pred, target, *, block_b=None):
    """pred: (B, C) float array (any float dtype), target: (B,) int array -> scalar f32."""
    B, C = pred.shape
    target2d = target.astype(jnp.int32).reshape(B, 1)

    if block_b is None:
        block_b = _choose_block_b(B, C, pred.dtype)
    block_b = max(8, (block_b // 8) * 8)

    # Pad the batch to a multiple of the tile; padded rows are masked in-kernel
    # (target = -1 never matches any class id).  Masking is compiled out when
    # no padding is required.
    Bp = _round_up(B, block_b)
    mask_padding = Bp != B
    if mask_padding:
        pred = jnp.pad(pred, ((0, Bp - B), (0, 0)))
        target2d = jnp.pad(target2d, ((0, Bp - B), (0, 0)), constant_values=-1)

    grid = (Bp // block_b,)
    kernel = functools.partial(_retina_entropy_kernel,
                               batch=B, mask_padding=mask_padding)

    out = pl.pallas_call(
        kernel,
        out_shape=jax.ShapeDtypeStruct((1, 1), jnp.float32),
        grid_spec=pltpu.PrefetchScalarGridSpec(
            num_scalar_prefetch=0,
            grid=grid,
            in_specs=[
                pl.BlockSpec((block_b, C), lambda i: (i, 0)),   # pred tile (native dtype)
                pl.BlockSpec((block_b, 1), lambda i: (i, 0)),   # target tile (int32)
            ],
            out_specs=pl.BlockSpec((1, 1), lambda i: (0, 0)),   # scalar, written on last step
            scratch_shapes=[
                pltpu.VMEM((1, C), jnp.float32),   # counts accumulator
                pltpu.VMEM((1, C), jnp.float32),   # colsum(z) accumulator
                pltpu.VMEM((1, 1), jnp.float32),   # sum(lse) accumulator
            ],
        ),
        compiler_params=pltpu.CompilerParams(
            dimension_semantics=("arbitrary",),    # sequential accumulation over batch tiles
        ),
    )(pred, target2d)
    return out[0, 0]


def _reference(pred, target):
    """Plain-JAX reference mirroring the PyTorch forward exactly."""
    prob = jax.nn.log_softmax(pred.astype(jnp.float32), axis=1)
    t = jnp.where(target > 1, 1, target)
    gathered = -prob[:, t]                 # (B, B): [i, j] = -logprob[i, t_j]
    batch_loss = gathered.sum(axis=1)      # (B,)
    return batch_loss.mean()


if __name__ == "__main__":
    key = jax.random.PRNGKey(0)
    k1, k2, k3, k4 = jax.random.split(key, 4)

    # Case 1: multi-tile accumulation path (4 grid steps of 8 rows), f32.
    B, C = 32, 5
    pred = jax.random.normal(k1, (B, C), dtype=jnp.float32)
    target = jax.random.randint(k2, (B,), 0, C, dtype=jnp.int32)  # includes labels > 1

    loss = retina_entropy_loss(pred, target, block_b=8)
    jax.block_until_ready(loss)
    ref = _reference(pred, target)
    assert jnp.allclose(loss, ref, rtol=1e-5, atol=1e-5), (loss, ref)

    # Case 2: ragged batch (padding + in-kernel masking) with bf16 input kept
    # in native dtype through the DMA and cast to f32 on-chip.
    B2, C2 = 11, 5
    pred2 = jax.random.normal(k3, (B2, C2), dtype=jnp.float32).astype(jnp.bfloat16)
    target2 = jax.random.randint(k4, (B2,), 0, C2, dtype=jnp.int32)

    loss2 = retina_entropy_loss(pred2, target2)
    jax.block_until_ready(loss2)
    ref2 = _reference(pred2.astype(jnp.float32), target2)
    assert jnp.allclose(loss2, ref2, rtol=2e-2, atol=2e-2), (loss2, ref2)

    print("KERNEL_OK")
</pallas_src>

<mosaic_0001>
module attributes {stable_mosaic.version = 11 : i64} {
  func.func @_retina_entropy_kernel(%arg0: i32, %arg1: memref<8x5xf32, #tpu.memory_space<vmem>>, %arg2: memref<8x1xi32, #tpu.memory_space<vmem>>, %arg3: memref<1x1xf32, #tpu.memory_space<vmem>>, %arg4: memref<1x5xf32, #tpu.memory_space<vmem>>, %arg5: memref<1x5xf32, #tpu.memory_space<vmem>>, %arg6: memref<1x1xf32, #tpu.memory_space<vmem>>) attributes {dimension_semantics = [#tpu.dimension_semantics<arbitrary>], iteration_bounds = array<i64: 4>, scalar_prefetch = 0 : i64, scratch_operands = 3 : i64, tpu.core_type = #tpu.core_type<tc>, window_params = [{transform_indices = @transform_0, window_bounds = array<i64: 8, 5>}, {transform_indices = @transform_1, window_bounds = array<i64: 8, 1>}, {pipeline_mode = #tpu.pipeline_mode<synchronous>, transform_indices = @transform_2, window_bounds = array<i64: 1, 1>}]} {
    %c0_i32 = arith.constant 0 : i32
    %0 = arith.cmpi eq, %arg0, %c0_i32 : i32
    %1 = arith.extui %0 : i1 to i32
    %c0_i32_0 = arith.constant 0 : i32
    %2 = arith.cmpi ne, %1, %c0_i32_0 : i32
    scf.if %2 {
      %cst_21 = arith.constant 0.000000e+00 : f32
      %38 = vector.broadcast %cst_21 : f32 to vector<1x5xf32>
      %c0_22 = arith.constant 0 : index
      %c0_23 = arith.constant 0 : index
      %39 = vector.load %arg4[%c0_22, %c0_23] : memref<1x5xf32, #tpu.memory_space<vmem>>, vector<1x5xf32>
      tpu.vector_store %arg4[%c0_22, %c0_23], %38 {strides = array<i32>} : memref<1x5xf32, #tpu.memory_space<vmem>>, vector<1x5xf32>,
      %cst_24 = arith.constant 0.000000e+00 : f32
      %40 = vector.broadcast %cst_24 : f32 to vector<1x5xf32>
      %c0_25 = arith.constant 0 : index
      %c0_26 = arith.constant 0 : index
      %41 = vector.load %arg5[%c0_25, %c0_26] : memref<1x5xf32, #tpu.memory_space<vmem>>, vector<1x5xf32>
      tpu.vector_store %arg5[%c0_25, %c0_26], %40 {strides = array<i32>} : memref<1x5xf32, #tpu.memory_space<vmem>>, vector<1x5xf32>,
      %cst_27 = arith.constant 0.000000e+00 : f32
      %42 = vector.broadcast %cst_27 : f32 to vector<1x1xf32>
      %c0_28 = arith.constant 0 : index
      %c0_29 = arith.constant 0 : index
      %43 = vector.load %arg6[%c0_28, %c0_29] : memref<1x1xf32, #tpu.memory_space<vmem>>, vector<1x1xf32>
      tpu.vector_store %arg6[%c0_28, %c0_29], %42 {strides = array<i32>} : memref<1x1xf32, #tpu.memory_space<vmem>>, vector<1x1xf32>,
    } else {
    }
    %c0 = arith.constant 0 : index
    %c0_1 = arith.constant 0 : index
    %3 = vector.load %arg1[%c0, %c0_1] : memref<8x5xf32, #tpu.memory_space<vmem>>, vector<8x5xf32>
    %c0_2 = arith.constant 0 : index
    %c0_3 = arith.constant 0 : index
    %4 = vector.load %arg2[%c0_2, %c0_3] : memref<8x1xi32, #tpu.memory_space<vmem>>, vector<8x1xi32>
    %cst = arith.constant dense<0xFF800000> : vector<8xf32>
    %5 = vector.multi_reduction <maximumf>, %3, %cst [1] : vector<8x5xf32> to vector<8xf32>
    %6 = vector.shape_cast %5 : vector<8xf32> to vector<8x1xf32>
    %7 = vector.broadcast %6 : vector<8x1xf32> to vector<8x5xf32>
    %8 = arith.subf %3, %7 : vector<8x5xf32>
    %9 = math.exp %8 : vector<8x5xf32>
    %cst_4 = arith.constant dense<0.000000e+00> : vector<8xf32>
    %10 = vector.multi_reduction <add>, %9, %cst_4 [1] : vector<8x5xf32> to vector<8xf32>
    %11 = vector.shape_cast %10 : vector<8xf32> to vector<8x1xf32>
    %12 = math.log %11 : vector<8x1xf32>
    %c1_i32 = arith.constant 1 : i32
    %13 = vector.broadcast %c1_i32 : i32 to vector<8x1xi32>
    %14 = arith.minsi %4, %13 : vector<8x1xi32>
    %15 = tpu.iota {dimensions = array<i32: 1>} : vector<8x5xi32>
    %16 = vector.broadcast %14 : vector<8x1xi32> to vector<8x5xi32>
    %17 = arith.cmpi eq, %15, %16 : vector<8x5xi32>
    %18 = arith.extui %17 : vector<8x5xi1> to vector<8x5xi32>
    %19 = arith.sitofp %18 : vector<8x5xi32> to vector<8x5xf32>
    %c0_5 = arith.constant 0 : index
    %c0_6 = arith.constant 0 : index
    %20 = vector.load %arg4[%c0_5, %c0_6] : memref<1x5xf32, #tpu.memory_space<vmem>>, vector<1x5xf32>
    %cst_7 = arith.constant dense<0.000000e+00> : vector<5xf32>
    %21 = vector.multi_reduction <add>, %19, %cst_7 [0] : vector<8x5xf32> to vector<5xf32>
    %22 = vector.shape_cast %21 : vector<5xf32> to vector<1x5xf32>
    %23 = arith.addf %20, %22 : vector<1x5xf32>
    %c0_8 = arith.constant 0 : index
    %c0_9 = arith.constant 0 : index
    %24 = vector.load %arg4[%c0_8, %c0_9] : memref<1x5xf32, #tpu.memory_space<vmem>>, vector<1x5xf32>
    tpu.vector_store %arg4[%c0_8, %c0_9], %23 {strides = array<i32>} : memref<1x5xf32, #tpu.memory_space<vmem>>, vector<1x5xf32>,
    %c0_10 = arith.constant 0 : index
    %c0_11 = arith.constant 0 : index
    %25 = vector.load %arg5[%c0_10, %c0_11] : memref<1x5xf32, #tpu.memory_space<vmem>>, vector<1x5xf32>
    %cst_12 = arith.constant dense<0.000000e+00> : vector<5xf32>
    %26 = vector.multi_reduction <add>, %8, %cst_12 [0] : vector<8x5xf32> to vector<5xf32>
    %27 = vector.shape_cast %26 : vector<5xf32> to vector<1x5xf32>
    %28 = arith.addf %25, %27 : vector<1x5xf32>
    %c0_13 = arith.constant 0 : index
    %c0_14 = arith.constant 0 : index
    %29 = vector.load %arg5[%c0_13, %c0_14] : memref<1x5xf32, #tpu.memory_space<vmem>>, vector<1x5xf32>
    tpu.vector_store %arg5[%c0_13, %c0_14], %28 {strides = array<i32>} : memref<1x5xf32, #tpu.memory_space<vmem>>, vector<1x5xf32>,
    %c0_15 = arith.constant 0 : index
    %c0_16 = arith.constant 0 : index
    %30 = vector.load %arg6[%c0_15, %c0_16] : memref<1x1xf32, #tpu.memory_space<vmem>>, vector<1x1xf32>
    %cst_17 = arith.constant dense<0.000000e+00> : vector<1xf32>
    %31 = vector.multi_reduction <add>, %12, %cst_17 [0] : vector<8x1xf32> to vector<1xf32>
    %32 = vector.shape_cast %31 : vector<1xf32> to vector<1x1xf32>
    %33 = arith.addf %30, %32 : vector<1x1xf32>
    %c0_18 = arith.constant 0 : index
    %c0_19 = arith.constant 0 : index
    %34 = vector.load %arg6[%c0_18, %c0_19] : memref<1x1xf32, #tpu.memory_space<vmem>>, vector<1x1xf32>
    tpu.vector_store %arg6[%c0_18, %c0_19], %33 {strides = array<i32>} : memref<1x1xf32, #tpu.memory_space<vmem>>, vector<1x1xf32>,
    %c3_i32 = arith.constant 3 : i32
    %35 = arith.cmpi eq, %arg0, %c3_i32 : i32
    %36 = arith.extui %35 : i1 to i32
    %c0_i32_20 = arith.constant 0 : i32
    %37 = arith.cmpi ne, %36, %c0_i32_20 : i32
    scf.if %37 {
      %c0_21 = arith.constant 0 : index
      %c0_22 = arith.constant 0 : index
      %38 = vector.load %arg4[%c0_21, %c0_22] : memref<1x5xf32, #tpu.memory_space<vmem>>, vector<1x5xf32>
      %c0_23 = arith.constant 0 : index
      %c0_24 = arith.constant 0 : index
      %39 = vector.load %arg5[%c0_23, %c0_24] : memref<1x5xf32, #tpu.memory_space<vmem>>, vector<1x5xf32>
      %40 = arith.mulf %38, %39 : vector<1x5xf32>
      %cst_25 = arith.constant dense<0.000000e+00> : vector<1xf32>
      %41 = vector.multi_reduction <add>, %40, %cst_25 [1] : vector<1x5xf32> to vector<1xf32>
      %42 = vector.shape_cast %41 : vector<1xf32> to vector<1x1xf32>
      %c0_26 = arith.constant 0 : index
      %c0_27 = arith.constant 0 : index
      %43 = vector.load %arg6[%c0_26, %c0_27] : memref<1x1xf32, #tpu.memory_space<vmem>>, vector<1x1xf32>
      %cst_28 = arith.constant 3.125000e-02 : f32
      %44 = vector.broadcast %cst_28 : f32 to vector<1x1xf32>
      %45 = arith.mulf %42, %44 : vector<1x1xf32>
      %46 = arith.subf %43, %45 : vector<1x1xf32>
      %c0_29 = arith.constant 0 : index
      %c0_30 = arith.constant 0 : index
      %47 = vector.load %arg3[%c0_29, %c0_30] : memref<1x1xf32, #tpu.memory_space<vmem>>, vector<1x1xf32>
      tpu.vector_store %arg3[%c0_29, %c0_30], %46 {strides = array<i32>} : memref<1x1xf32, #tpu.memory_space<vmem>>, vector<1x1xf32>,
    } else {
    }
    return
  }
  func.func @transform_0(%arg0: i32) -> (i32, i32) {
    %c0_i32 = arith.constant 0 : i32
    %c0_i32_0 = arith.constant 0 : i32
    return %arg0, %c0_i32 : i32, i32
  }
  func.func @transform_1(%arg0: i32) -> (i32, i32) {
    %c0_i32 = arith.constant 0 : i32
    %c0_i32_0 = arith.constant 0 : i32
    return %arg0, %c0_i32 : i32, i32
  }
  func.func @transform_2(%arg0: i32) -> (i32, i32) {
    %c0_i32 = arith.constant 0 : i32
    %c0_i32_0 = arith.constant 0 : i32
    %c0_i32_1 = arith.constant 0 : i32
    return %c0_i32, %c0_i32_0 : i32, i32
  }
}

</mosaic_0001>

<bundles_post_ra>
// kernel: tpu_custom_call.1
= control target key start
LH: loop header
LB: loop body
LE: loop exit
PB: predicated region body
PF: predicated region fallthrough
CT: control target
= control target key end

     0   :  { %7 = vsyncpa [#allocation6], 0  ;;  %s374_s9 = smov 0   ;;  %s427_s0 = inlined_call_operand.vmem [shape: f32[32,5], index: 0, kind: input, shape index: {}]   ;;  %s428_s1 = inlined_call_operand.vmem [shape: s32[32,1], index: 1, kind: input, shape index: {}]   ;;  %s429_s2 = inlined_call_operand.hbm [shape: f32[1,1], index: 2, kind: output, shape index: {}]  }
   0x1 LB: > { %s380_s10 = sadd.s32 4294967295, %s353_s9   ;;  %p283_p0 = scmp.ge.s32.totalorder %s353_s9, 1  ;;  %s353_s9 = sphi %s374_s9, %s13_s9  }
   0x2   : > { %p116_p1 = scmp.lt.s32.totalorder %s353_s9, 5 }
   0x4   : > { %p117_p2 = pnand %p283_p0, %p116_p1 }
   0x5   : > { %p136_p3 = scmp.lt.s32.totalorder (!%p117_p2), %s380_s10, 3  ;;  %p286_p4 = scmp.ne.s32.totalorder (!%p117_p2), %s380_s10, 0 }
   0x6   : > { %120 = sbr.rel (%p117_p2) target bundleno = 386 (0x182), region = 28 }
   0xd   : > { %s137_s11 = scalar_select %p136_p3, %s380_s10, 3 }
   0xe   : > { %147 = sbr.rel (%p286_p4) target bundleno = 21 (0x15), region = 32  ;;  %vm148_vm0 = vcmask (!%p286_p4), 32768   ;;  %vm151_vm1 = vcmask (!%p286_p4), 0   ;;  %v355_v0 = vmov (!%p286_p4), 0.0  }
   0xf   : > { %s284_s12 = sshll.u32 %s137_s11, 3  ;;  %149 = vst.msk [vmem:[#allocation2] sm:$0x1] (!%p286_p4), %vm148_vm0, %v355_v0  ;;  %150 = vst.msk [vmem:[#allocation3] sm:$0x1] (!%p286_p4), %vm148_vm0, %v355_v0 }
  0x10   : > { %s139_s15 = scalar_lea.vmem %s427_s0, %s284_s12  ;;  %s143_s18 = scalar_lea.vmem %s428_s1, %s284_s12  ;;  %152 = vst.msk [vmem:[#allocation4] sm:$0x1] (!%p286_p4), %vm151_vm1, %v355_v0 }
  0x15 PF: > { %v153_v1 = vld [vmem:[%s139_s15] sm:$0xff]  ;;  %vm155_vm2 = vcmask 39936   ;;  %v356_v4 = vmov 0   ;;  %vm186_vm4 = vcmask 32768   ;;  %v169_v20 = vlaneseq  ;;  %p288_p5 = scmp.ne.s32.totalorder %s380_s10, 3 }
  0x16   : > { %v156_v2 = vsel %vm155_vm2, %v153_v1, -inf  ;;  %v154_v3 = vld [vmem:[%s143_s18] sm:$0xff]  ;;  %311 = vset.pattern.permute.xlu1 %v356_v4  ;;  %312 = vset.pattern.permute.xlu0 %v356_v4  ;;  %v357_v23 = vmov 0.0   ;;  %vm206_vm6 = vcmask 0  }
  0x17   : > { %157 = vmax.xlane.f32.xlu0 %v156_v2  ;;  %vm167_vm3 = vcmp.lt.s32.totalorder %v154_v3, 1  ;;  %v188_v15 = vld [vmem:[#allocation3] sm:$0x1]  ;;  %v170_v21 = vand.u32 127, %v169_v20  ;;  %v177_v32 = vld [vmem:[#allocation2] sm:$0x1] }
  0x18   : > { %v168_v5 = vsel %vm167_vm3, %v154_v3, 1  ;;  %v198_v42 = vld [vmem:[#allocation4] sm:$0x1] }
  0x19   : > { %172 = vperm.xlu1 %311, %v168_v5  }
  0x98   : > { %v173_v22 = vpop.permute.xlu1 %172 }
  0x99   : > { %vm174_vm5 = vcmp.eq.s32.totalorder %v170_v21, %v173_v22 }
  0x9a   : > { %v287_v24 = vsel %vm174_vm5, 1.0, %v357_v23 }
  0x9b   : > { %v178_v25 = vsel %vm155_vm2, %v287_v24, 0.0 }
  0x9c   : > { %v179_v26 = vrot.slane %v178_v25, 4 }
  0x9e   : > { %v180_v27 = vadd.f32 %v179_v26, %v178_v25 }
  0xa0   : > { %v181_v28 = vrot.slane %v180_v27, 2 }
  0xa2   : > { %v182_v29 = vadd.f32 %v181_v28, %v180_v27 }
  0xa4   : > { %v158_v6 = vpop.xlane.xlu0 %157  ;;  %v183_v30 = vrot.slane %v182_v29, 1 }
  0xa5   : > { %v159_v7 = vsub.f32 %v153_v1, %v158_v6 }
  0xa6   : > { %v184_v31 = vadd.f32 %v183_v30, %v182_v29 }
  0xa7   : > { %v160_v8 = vmul.f32 1.442695, %v159_v7  ;;  %v189_v9 = vsel %vm155_vm2, %v159_v7, 0.0 }
  0xa8   : > { %v190_v10 = vrot.slane %v189_v9, 4  ;;  %v185_v33 = vadd.f32 %v184_v31, %v177_v32 }
  0xa9   : > { %313 = vpow2.f32 %v160_v8 }
  0xaa   : > { %v191_v11 = vadd.f32 %v190_v10, %v189_v9  ;;  %187 = vst.msk [vmem:[#allocation2] sm:$0x1] %vm186_vm4, %v185_v33 }
  0xac   : > { %v192_v12 = vrot.slane %v191_v11, 2 }
  0xae   : > { %v193_v13 = vadd.f32 %v192_v12, %v191_v11 }
  0xb0   : > { %v194_v14 = vrot.slane %v193_v13, 1 }
  0xb1   : > { %v212_v45 = vld [vmem:[#allocation2] sm:$0x1] (!%p288_p5) }
  0xb2   : > { %v195_v16 = vadd.f32 %v194_v14, %v193_v13 }
  0xb3   : > { %v314_v17 = vpop.eup %313 }
  0xb4   : > { %v196_v18 = vadd.f32 %v195_v16, %v188_v15  ;;  %v162_v19 = vsel %vm155_vm2, %v314_v17, 0.0 }
  0xb5   : > { %163 = vadd.xlane.f32.xlu0 %v162_v19 }
  0xb6   : > { %197 = vst.msk [vmem:[#allocation3] sm:$0x1] %vm186_vm4, %v196_v18 }
  0xbd   : > { %v213_v46 = vld [vmem:[#allocation3] sm:$0x1] (!%p288_p5) }
  0xbe   : > { %v214_v47 = vmul.f32 (!%p288_p5), %v213_v46, %v212_v45 }
  0xc0   : > { %v215_v48 = vsel (!%p288_p5), %vm186_vm4, %v214_v47, 0.0 }
  0xc1   : > { %216 = vadd.xlane.f32.xlu0 (!%p288_p5), %v215_v48 }
 0x142   : > { %v164_v34 = vpop.xlane.xlu0 %163 }
 0x143   : > { %315 = vlog2.f32 %v164_v34 }
 0x14d   : > { %v316_v35 = vpop.eup %315 }
 0x14e   : > { %v166_v36 = vmul.f32 0.6931472, %v316_v35  ;;  %v217_v49 = vpop.xlane.xlu0 (!%p288_p5), %216 }
 0x14f   : > { %v219_v51 = vmul.f32 (!%p288_p5), 0.03125, %v217_v49 }
 0x150   : > { %v199_v37 = vrot.slane %v166_v36, 4 }
 0x152   : > { %v200_v38 = vadd.f32 %v199_v37, %v166_v36 }
 0x154   : > { %v201_v39 = vrot.slane %v200_v38, 2 }
 0x156   : > { %v202_v40 = vadd.f32 %v201_v39, %v200_v38 }
 0x158   : > { %v203_v41 = vrot.slane %v202_v40, 1  ;;  %211 = sbr.rel (%p288_p5) target bundleno = 361 (0x169), region = 36 }
 0x15a   : > { %v204_v43 = vadd.f32 %v203_v41, %v202_v40 }
 0x15c   : > { %v205_v44 = vadd.f32 %v204_v43, %v198_v42 }
 0x15e   : > { %207 = vst.msk [vmem:[#allocation4] sm:$0x1] %vm206_vm6, %v205_v44 }
 0x165   : > { %v218_v50 = vld [vmem:[#allocation4] sm:$0x1] }
 0x166   : > { %v220_v52 = vsub.f32 %v218_v50, %v219_v51 }
 0x168   : > { %221 = vst.msk [vmem:[#allocation5] sm:$0x1] %vm206_vm6, %v220_v52 }
 0x169 PF: > { %p297_p6 = scmp.eq.s32.totalorder %s380_s10, 3  ;;  %s358_s19 = smov [#allocation5]  }
 0x16a   : > { %s229_s20 = sshll.u32 %s358_s19, 4  ;;  %s230_s20 = int_to_ptr.vmem [resolvable:$true] %s229_s20 }
 0x16b   : > { %s317_s21 = scalar_lea.vmem %s230_s20, 16  ;;  %s323_s22 = scalar_lea.vmem %s230_s20, 32 }
 0x16c   : > { %p318_p7 = scmp.ne.s32.totalorder %s230_s20, %s317_s21  ;;  %p324_p10 = scmp.lt.s32.totalorder %s230_s20, %s230_s20 }
 0x16d   : > { %p325_p11 = scmp.lt.s32.totalorder %s323_s22, %s317_s21 }
 0x16e   : > { %p319_p8 = pnand %p318_p7, %p297_p6 }
 0x16f   : > { %p326_p12 = por %p325_p11, %p324_p10 }
 0x170   : > { %p320_p9 = pneg %p319_p8 }
 0x172   : > { %p327_p13 = pnand %p326_p12, %p320_p9 }
 0x174   : > { %330 = shalt.err (!%p327_p13)
}
 0x175   : > { %s331_s25 = scalar_lea.hbm %s429_s2, 16 }
 0x176   : > { %p332_p0 = scmp.ne.s32.totalorder %s429_s2, %s331_s25  ;;  %p337_p3 = scmp.lt.u32.totalorder %s331_s25, %s429_s2 }
 0x178   : > { %p333_p1 = pnand %p332_p0, %p297_p6 }
 0x17a   : > { %p334_p2 = pneg %p333_p1 }
 0x17c   : > { %p339_p4 = pnand %p337_p3, %p334_p2 }
 0x17e   : > { %342 = shalt.err (!%p339_p4)
}
 0x17f   : > { %294 = dma.vmem_to_hbm [thread:$0]  (%p297_p6), %s230_s20, 16, %s429_s2, [#allocation6]  }
 0x180   : > { %348 = dma.done.wait (%p297_p6), [#allocation6], 16  }
 0x181   : > { %350 = vsyncadd (%p297_p6), [#allocation6], 4294967280 }
 0x182 PF: > { %s13_s9 = sadd.s32 1, %s353_s9  }
 0x183   : > { %p10_p5 = scmp.ge.s32.totalorder %s13_s9, 6  }
 0x185   :  { %12 = sbr.rel (!%p10_p5) target bundleno = 1 (0x1), region = 66 }
 0x18c   :  { %242 = vsyncpa [#allocation6], 1 }
 0x18d   :  { %244 = vsyncpa [#allocation6 + $0x1], 1 }

</bundles_post_ra>
